<compile_context>
chip_gen: v6e
topology: v6e:2x2x1
jax: 0.10.0
libtpu: 0.0.40
codegen_flags: <defaults>
</compile_context>

<pallas_src>
import functools

import jax
import jax.numpy as jnp
from jax.experimental import pallas as pl
from jax.experimental.pallas import tpu as pltpu


def _xla_space_to_depth(x):
    """Pure-XLA reference / fallback (exact for every dtype)."""
    return jnp.concatenate(
        [x[..., ::2, ::2], x[..., 1::2, ::2], x[..., ::2, 1::2], x[..., 1::2, 1::2]],
        axis=1,
    )


def _make_band_selector(band):
    """(band, band) bf16 one-hot: out cols [0,band/2) = even src cols, rest = odd."""
    half = band // 2
    j = jnp.arange(band)
    src = jnp.where(j < half, 2 * j, 2 * (j - half) + 1)
    return (jnp.arange(band)[:, None] == src[None, :]).astype(jnp.bfloat16)


def _pick_band(w):
    """Largest even divisor of W that is <= 256 (dense fallback if only tiny ones)."""
    if w <= 256:
        return w
    best = 2
    for b in range(2, 257, 2):
        if w % b == 0:
            best = b
    return best if best >= 64 else w


def _pick_rows(r_total, row_bytes, itemsize, n_batch, block_budget):
    """Rows per grid step: dtype-aligned sublanes, fits VMEM budget, >=8 steps if possible."""
    align = max(1, 32 // itemsize)            # 8 sublanes f32 / 16 bf16 / 32 int8
    cands = [r for r in range(align, r_total + 1, align)
             if r_total % r == 0 and r * row_bytes <= block_budget]
    if not cands:
        # No aligned divisor fits the budget: use an aligned non-divisor chunk;
        # Pallas masks the ragged final block.  (Replaces the old whole-C fallback.)
        r_max = (block_budget // max(row_bytes, 1)) // align * align
        r_max = min(max(r_max, align), r_total)
        cands = list(range(align, r_max + 1, align)) or [min(align, r_total)]
    min_steps = 8                             # feed both v7x TCs, hide DMA ramp-up
    rows = cands[-1]
    for r in sorted(cands, reverse=True):
        rows = r
        if n_batch * (-(-r_total // r)) >= min_steps:
            break
    return rows


def _s2d_kernel(x_ref, p_ref, o_ref, *, w, band, exact_split):
    # x_ref: (1, R, 2W)   lanes [0,W) = even source row, [W,2W) = odd source row
    # p_ref: (band, band) bf16 fused selector (even cols first, then odd cols)
    # o_ref: (1, 4, R, W/2) quadrant-major output slab
    half = band // 2
    n_bands = w // band
    p = p_ref[...]
    out_dt = o_ref.dtype

    for k in range(n_bands):                      # static unroll over column bands
        c_lo, c_hi = k * half, (k + 1) * half
        for parity in (0, 1):                     # 0: even src row, 1: odd src row
            base = parity * w + k * band
            xb = x_ref[0, :, base:base + band]    # (R, band) contiguous lane slice
            if exact_split:
                # Exact f32/f16 via 3 bf16 components (hi + mid + lo == x for
                # normal values); each dot is one native bf16 MXU pass.
                x32 = xb.astype(jnp.float32)
                hi = x32.astype(jnp.bfloat16)
                r1 = x32 - hi.astype(jnp.float32)
                mid = r1.astype(jnp.bfloat16)
                lo = (r1 - mid.astype(jnp.float32)).astype(jnp.bfloat16)
                y = jnp.dot(hi, p, preferred_element_type=jnp.float32)
                y = y + jnp.dot(mid, p, preferred_element_type=jnp.float32)
                y = y + jnp.dot(lo, p, preferred_element_type=jnp.float32)
            else:                                  # bf16 input: one exact pass
                y = jnp.dot(xb, p, preferred_element_type=jnp.float32)
            # torch.cat order: [ee, oe, eo, oo] -> quadrant = 2*col_parity + row_parity
            o_ref[0, parity, :, c_lo:c_hi] = y[:, :half].astype(out_dt)
            o_ref[0, 2 + parity, :, c_lo:c_hi] = y[:, half:].astype(out_dt)


def space_to_depth(x):
    """x: (N, C, H, W) with even H, W -> (N, 4C, H//2, W//2) in torch.cat order."""
    n, c, h, w = x.shape
    assert h % 2 == 0 and w % 2 == 0, "space_to_depth needs even H and W"
    h2, w2 = h // 2, w // 2

    if (not jnp.issubdtype(x.dtype, jnp.floating)) or x.dtype == jnp.float64:
        # TODO(synk): integer/bool/f64 inputs fall back to XLA slicing; an exact
        # in-kernel path would need a non-MXU (XLU/VPU) lane de-interleave.
        return _xla_space_to_depth(x)

    exact_split = x.dtype != jnp.bfloat16      # f32 / f16 -> exact 3x bf16 split
    band = _pick_band(w)
    selector = _make_band_selector(band)

    r_total = c * h2
    itemsize = x.dtype.itemsize
    row_bytes = 2 * w * itemsize               # one fused slab row

    vmem_cap = 64 << 20                        # assume tightest (v7x) if query fails
    try:
        vmem_cap = int(pltpu.get_tpu_info().vmem_capacity_bytes)
    except Exception:
        pass
    block_budget = max(vmem_cap // 16, 1 << 20)      # ~4 MiB v7x, ~8 MiB v5e/v6e
    rows = _pick_rows(r_total, row_bytes, itemsize, n, block_budget)

    # Double-buffered in/out blocks + selector + per-band temporaries + headroom.
    block_bytes = rows * row_bytes
    sel_bytes = band * band * 2
    vmem_limit = 4 * block_bytes + 2 * sel_bytes + 16 * rows * band + (8 << 20)
    vmem_limit = int(min(max(vmem_limit, 16 << 20), max(vmem_cap - (8 << 20), 16 << 20)))

    # Free contiguous reshape: slab row c*h2 + t holds [x[c, 2t, :], x[c, 2t+1, :]].
    xr = x.reshape(n, r_total, 2 * w)

    kernel = functools.partial(_s2d_kernel, w=w, band=band, exact_split=exact_split)
    out = pl.pallas_call(
        kernel,
        out_shape=jax.ShapeDtypeStruct((n, 4, r_total, w2), x.dtype),
        grid=(n, pl.cdiv(r_total, rows)),
        in_specs=[
            pl.BlockSpec((1, rows, 2 * w), lambda b, r: (b, r, 0)),
            pl.BlockSpec((band, band), lambda b, r: (0, 0)),
        ],
        out_specs=pl.BlockSpec((1, 4, rows, w2), lambda b, r: (b, 0, r, 0)),
        compiler_params=pltpu.CompilerParams(
            dimension_semantics=("parallel", "parallel"),
            vmem_limit_bytes=vmem_limit,
        ),
    )(xr, selector)

    # Free contiguous reshape to the torch.cat([...], dim=1) channel layout:
    # (N, 4, C*H2, W2) == (N, 4, C, H2, W2) row-major -> (N, 4C, H2, W2).
    return out.reshape(n, 4 * c, h2, w2)


if __name__ == "__main__":
    key = jax.random.PRNGKey(0)

    # f32 path (exact 3x bf16 split)
    x = jax.random.normal(key, (2, 4, 16, 16), dtype=jnp.float32)
    out = jax.block_until_ready(space_to_depth(x))
    ref = _xla_space_to_depth(x)
    assert out.shape == (2, 16, 8, 8), out.shape
    assert jnp.array_equal(out, ref), "f32 mismatch vs reference"

    # bf16 path (single-pass dot, 16-sublane alignment)
    xb = x.astype(jnp.bfloat16)
    outb = jax.block_until_ready(space_to_depth(xb))
    assert jnp.array_equal(outb, _xla_space_to_depth(xb)), "bf16 mismatch vs reference"

    # multi-band path (W > 256 -> banded selector)
    x2 = jax.random.normal(jax.random.PRNGKey(0), (1, 2, 8, 320), dtype=jnp.float32)
    out2 = jax.block_until_ready(space_to_depth(x2))
    assert jnp.array_equal(out2, _xla_space_to_depth(x2)), "banded mismatch vs reference"

    print("KERNEL_OK")
</pallas_src>

<mosaic_0001>
module attributes {stable_mosaic.version = 11 : i64} {
  func.func @_s2d_kernel(%arg0: i32, %arg1: i32, %arg2: memref<1x8x32xf32, #tpu.memory_space<vmem>>, %arg3: memref<16x16xbf16, #tpu.memory_space<vmem>>, %arg4: memref<1x4x8x8xf32, #tpu.memory_space<vmem>>) attributes {dimension_semantics = [#tpu.dimension_semantics<parallel>, #tpu.dimension_semantics<parallel>], iteration_bounds = array<i64: 2, 4>, scalar_prefetch = 0 : i64, scratch_operands = 0 : i64, tpu.core_type = #tpu.core_type<tc>, window_params = [{transform_indices = @transform_0, window_bounds = array<i64: 1, 8, 32>}, {pipeline_mode = #tpu.pipeline_mode<synchronous>, transform_indices = @transform_1, window_bounds = array<i64: 16, 16>}, {transform_indices = @transform_2, window_bounds = array<i64: 1, 4, 8, 8>}]} {
    %c0 = arith.constant 0 : index
    %c0_0 = arith.constant 0 : index
    %0 = vector.load %arg3[%c0, %c0_0] : memref<16x16xbf16, #tpu.memory_space<vmem>>, vector<16x16xbf16>
    %c0_1 = arith.constant 0 : index
    %c0_2 = arith.constant 0 : index
    %c0_3 = arith.constant 0 : index
    %1 = vector.load %arg2[%c0_1, %c0_2, %c0_3] : memref<1x8x32xf32, #tpu.memory_space<vmem>>, vector<1x8x16xf32>
    %2 = vector.shape_cast %1 : vector<1x8x16xf32> to vector<8x16xf32>
    %3 = arith.truncf %2 : vector<8x16xf32> to vector<8x16xbf16>
    %4 = arith.extf %3 : vector<8x16xbf16> to vector<8x16xf32>
    %5 = arith.subf %2, %4 : vector<8x16xf32>
    %6 = arith.truncf %5 : vector<8x16xf32> to vector<8x16xbf16>
    %7 = arith.extf %6 : vector<8x16xbf16> to vector<8x16xf32>
    %8 = arith.subf %5, %7 : vector<8x16xf32>
    %9 = arith.truncf %8 : vector<8x16xf32> to vector<8x16xbf16>
    %cst = arith.constant dense<0.000000e+00> : vector<8x16xf32>
    %10 = tpu.matmul %3, %0, %cst {dimension_numbers = #tpu.dot_dimension_numbers<[1], [0], [0], [1], [0, 0, 1, 1], [], []>} : vector<8x16xbf16>, vector<16x16xbf16>, vector<8x16xf32> -> vector<8x16xf32>
    %cst_4 = arith.constant dense<0.000000e+00> : vector<8x16xf32>
    %11 = tpu.matmul %6, %0, %cst_4 {dimension_numbers = #tpu.dot_dimension_numbers<[1], [0], [0], [1], [0, 0, 1, 1], [], []>} : vector<8x16xbf16>, vector<16x16xbf16>, vector<8x16xf32> -> vector<8x16xf32>
    %12 = arith.addf %10, %11 : vector<8x16xf32>
    %cst_5 = arith.constant dense<0.000000e+00> : vector<8x16xf32>
    %13 = tpu.matmul %9, %0, %cst_5 {dimension_numbers = #tpu.dot_dimension_numbers<[1], [0], [0], [1], [0, 0, 1, 1], [], []>} : vector<8x16xbf16>, vector<16x16xbf16>, vector<8x16xf32> -> vector<8x16xf32>
    %14 = arith.addf %12, %13 : vector<8x16xf32>
    %15 = vector.extract_strided_slice %14 {offsets = [0, 0], sizes = [8, 8], strides = [1, 1]} : vector<8x16xf32> to vector<8x8xf32>
    %c0_6 = arith.constant 0 : index
    %c0_7 = arith.constant 0 : index
    %c0_8 = arith.constant 0 : index
    %c0_9 = arith.constant 0 : index
    %16 = vector.load %arg4[%c0_6, %c0_7, %c0_8, %c0_9] : memref<1x4x8x8xf32, #tpu.memory_space<vmem>>, vector<1x1x8x8xf32>
    %17 = vector.shape_cast %16 : vector<1x1x8x8xf32> to vector<8x8xf32>
    %18 = vector.shape_cast %15 : vector<8x8xf32> to vector<1x1x8x8xf32>
    tpu.vector_store %arg4[%c0_6, %c0_7, %c0_8, %c0_9], %18 {strides = array<i32>} : memref<1x4x8x8xf32, #tpu.memory_space<vmem>>, vector<1x1x8x8xf32>,
    %19 = vector.extract_strided_slice %14 {offsets = [0, 8], sizes = [8, 8], strides = [1, 1]} : vector<8x16xf32> to vector<8x8xf32>
    %c0_10 = arith.constant 0 : index
    %c2 = arith.constant 2 : index
    %c0_11 = arith.constant 0 : index
    %c0_12 = arith.constant 0 : index
    %20 = vector.load %arg4[%c0_10, %c2, %c0_11, %c0_12] : memref<1x4x8x8xf32, #tpu.memory_space<vmem>>, vector<1x1x8x8xf32>
    %21 = vector.shape_cast %20 : vector<1x1x8x8xf32> to vector<8x8xf32>
    %22 = vector.shape_cast %19 : vector<8x8xf32> to vector<1x1x8x8xf32>
    tpu.vector_store %arg4[%c0_10, %c2, %c0_11, %c0_12], %22 {strides = array<i32>} : memref<1x4x8x8xf32, #tpu.memory_space<vmem>>, vector<1x1x8x8xf32>,
    %c0_13 = arith.constant 0 : index
    %c0_14 = arith.constant 0 : index
    %c16 = arith.constant 16 : index
    %23 = vector.load %arg2[%c0_13, %c0_14, %c16] : memref<1x8x32xf32, #tpu.memory_space<vmem>>, vector<1x8x16xf32>
    %24 = vector.shape_cast %23 : vector<1x8x16xf32> to vector<8x16xf32>
    %25 = arith.truncf %24 : vector<8x16xf32> to vector<8x16xbf16>
    %26 = arith.extf %25 : vector<8x16xbf16> to vector<8x16xf32>
    %27 = arith.subf %24, %26 : vector<8x16xf32>
    %28 = arith.truncf %27 : vector<8x16xf32> to vector<8x16xbf16>
    %29 = arith.extf %28 : vector<8x16xbf16> to vector<8x16xf32>
    %30 = arith.subf %27, %29 : vector<8x16xf32>
    %31 = arith.truncf %30 : vector<8x16xf32> to vector<8x16xbf16>
    %cst_15 = arith.constant dense<0.000000e+00> : vector<8x16xf32>
    %32 = tpu.matmul %25, %0, %cst_15 {dimension_numbers = #tpu.dot_dimension_numbers<[1], [0], [0], [1], [0, 0, 1, 1], [], []>} : vector<8x16xbf16>, vector<16x16xbf16>, vector<8x16xf32> -> vector<8x16xf32>
    %cst_16 = arith.constant dense<0.000000e+00> : vector<8x16xf32>
    %33 = tpu.matmul %28, %0, %cst_16 {dimension_numbers = #tpu.dot_dimension_numbers<[1], [0], [0], [1], [0, 0, 1, 1], [], []>} : vector<8x16xbf16>, vector<16x16xbf16>, vector<8x16xf32> -> vector<8x16xf32>
    %34 = arith.addf %32, %33 : vector<8x16xf32>
    %cst_17 = arith.constant dense<0.000000e+00> : vector<8x16xf32>
    %35 = tpu.matmul %31, %0, %cst_17 {dimension_numbers = #tpu.dot_dimension_numbers<[1], [0], [0], [1], [0, 0, 1, 1], [], []>} : vector<8x16xbf16>, vector<16x16xbf16>, vector<8x16xf32> -> vector<8x16xf32>
    %36 = arith.addf %34, %35 : vector<8x16xf32>
    %37 = vector.extract_strided_slice %36 {offsets = [0, 0], sizes = [8, 8], strides = [1, 1]} : vector<8x16xf32> to vector<8x8xf32>
    %c0_18 = arith.constant 0 : index
    %c1 = arith.constant 1 : index
    %c0_19 = arith.constant 0 : index
    %c0_20 = arith.constant 0 : index
    %38 = vector.load %arg4[%c0_18, %c1, %c0_19, %c0_20] : memref<1x4x8x8xf32, #tpu.memory_space<vmem>>, vector<1x1x8x8xf32>
    %39 = vector.shape_cast %38 : vector<1x1x8x8xf32> to vector<8x8xf32>
    %40 = vector.shape_cast %37 : vector<8x8xf32> to vector<1x1x8x8xf32>
    tpu.vector_store %arg4[%c0_18, %c1, %c0_19, %c0_20], %40 {strides = array<i32>} : memref<1x4x8x8xf32, #tpu.memory_space<vmem>>, vector<1x1x8x8xf32>,
    %41 = vector.extract_strided_slice %36 {offsets = [0, 8], sizes = [8, 8], strides = [1, 1]} : vector<8x16xf32> to vector<8x8xf32>
    %c0_21 = arith.constant 0 : index
    %c3 = arith.constant 3 : index
    %c0_22 = arith.constant 0 : index
    %c0_23 = arith.constant 0 : index
    %42 = vector.load %arg4[%c0_21, %c3, %c0_22, %c0_23] : memref<1x4x8x8xf32, #tpu.memory_space<vmem>>, vector<1x1x8x8xf32>
    %43 = vector.shape_cast %42 : vector<1x1x8x8xf32> to vector<8x8xf32>
    %44 = vector.shape_cast %41 : vector<8x8xf32> to vector<1x1x8x8xf32>
    tpu.vector_store %arg4[%c0_21, %c3, %c0_22, %c0_23], %44 {strides = array<i32>} : memref<1x4x8x8xf32, #tpu.memory_space<vmem>>, vector<1x1x8x8xf32>,
    return
  }
  func.func @transform_0(%arg0: i32, %arg1: i32) -> (i32, i32, i32) {
    %c0_i32 = arith.constant 0 : i32
    %c0_i32_0 = arith.constant 0 : i32
    return %arg0, %arg1, %c0_i32 : i32, i32, i32
  }
  func.func @transform_1(%arg0: i32, %arg1: i32) -> (i32, i32) {
    %c0_i32 = arith.constant 0 : i32
    %c0_i32_0 = arith.constant 0 : i32
    %c0_i32_1 = arith.constant 0 : i32
    return %c0_i32, %c0_i32_0 : i32, i32
  }
  func.func @transform_2(%arg0: i32, %arg1: i32) -> (i32, i32, i32, i32) {
    %c0_i32 = arith.constant 0 : i32
    %c0_i32_0 = arith.constant 0 : i32
    %c0_i32_1 = arith.constant 0 : i32
    return %arg0, %c0_i32, %arg1, %c0_i32_0 : i32, i32, i32, i32
  }
}

</mosaic_0001>

<bundles_post_ra>
// kernel: tpu_custom_call.1
= control target key start
LH: loop header
LB: loop body
LE: loop exit
PB: predicated region body
PF: predicated region fallthrough
CT: control target
= control target key end

     0   :  { %s1126_s0 = inlined_call_operand.hbm [shape: f32[2,32,32], index: 0, kind: input, shape index: {}]   ;;  %s1127_s1 = inlined_call_operand.hbm [shape: bf16[16,16], index: 1, kind: input, shape index: {}]   ;;  %s1128_s2 = inlined_call_operand.vmem [shape: f32[2,4,32,8], index: 2, kind: output, shape index: {}]  }
   0x1   :  { %1130 = sst [smem:[#allocation10_spill]] %s1127_s1 }
   0x2   :  { %7 = vsyncpa [#allocation3], 0 }
   0x3   :  { %9 = vsyncpa [#allocation3 + $0x1], 0 }
   0x4   :  { %10 = vsyncpa [#allocation5], 0  ;;  %s955_s9 = smov 0   ;;  %s957_s10 = smov 0  }
   0x5   :  { %s959_s11 = smov 0   ;;  %s961_s12 = smov 0  }
   0x6   :  { %s963_s13 = smov 0   ;;  %s965_s14 = smov 0  }
   0x7   :  { %s967_s15 = smov 0   ;;  %s969_s16 = smov 0  }
   0x8 LB: > { %s642_s17 = sadd.s32 4294967295, %s930_s16   ;;  %p50_p0 = scmp.ne.s32.totalorder %s906_s10, %s902_s9  ;;  %s930_s16 = sphi %s969_s16, %s16_s16   ;;  %s926_s15 = sphi %s967_s15, %s1147_s15   ;;  %s922_s14 = sphi %s965_s14, %s1146_s14   ;;  %s918_s13 = sphi %s963_s13, %s1145_s13   ;;  %s914_s12 = sphi %s961_s12, %s1144_s12   ;;  %s910_s11 = sphi %s959_s11, %s1143_s11   ;;  %s906_s10 = sphi %s957_s10, %s1142_s10   ;;  %s902_s9 = sphi %s955_s9, %s1141_s9  }
   0x9   : > { %p995_p1 = scmp.eq.s32.totalorder %s642_s17, 0  ;;  %p644_p2 = scmp.ge.s32.totalorder %s930_s16, 1 }
   0xa   : > { %p110_p3 = scmp.lt.s32.totalorder %s930_s16, 9  ;;  %s932_s21 = smov [#allocation4]  }
   0xb   : > { %p1003_p4 = por %p995_p1, %p50_p0  ;;  %s122_s22 = sshll.u32 %s932_s21, 4  ;;  %s123_s22 = int_to_ptr.vmem [resolvable:$true] %s122_s22 }
   0xc   : > { %p1007_p5 = pnand %p644_p2, %p110_p3  ;;  %s817_s23 = scalar_lea.vmem %s123_s22, 128 }
   0xd   : > { %p818_p9 = scmp.ne.s32.totalorder %s123_s22, %s817_s23  ;;  %p825_p12 = scmp.lt.s32.totalorder %s123_s22, %s123_s22 }
   0xe   : > { %p723_p6 = pneg %p1007_p5  ;;  %p826_p13 = scmp.lt.s32.totalorder %s817_s23, %s817_s23 }
  0x10   : > { %p724_p7 = pnand %p723_p6, %p995_p1  ;;  %p827_p0 = por %p826_p13, %p825_p12 }
  0x12   : > { %p808_p8 = pneg %p724_p7 }
  0x14   : > { %p820_p10 = pnand %p818_p9, %p808_p8 }
  0x16   : > { %p821_p11 = pneg %p820_p10 }
  0x18   : > { %p828_p2 = pnand %p827_p0, %p821_p11 }
  0x1a   : > { %831 = shalt.err (!%p828_p2)
}
  0x1b   : > { %s933_s24 = smov 64   ;;  %s934_s25 = smov 4  }
  0x1c   : > { %s1134_s1 = sld [smem:[#allocation10_spill]]  ;;  %p97_p3 = scmp.eq.s32.totalorder %s642_s17, 7 }
  0x1d   : > { %s25_s28 = sadd.s32 1, %s922_s14  ;;  %s28_s29 = sadd.s32 1, %s926_s15 }
  0x1e   : > { %p26_p6 = scmp.ge.s32.totalorder %s25_s28, 4  ;;  %p44_p8 = scmp.ne.s32.totalorder %s910_s11, %s906_s10 }
  0x1f   : > { %p45_p9 = scmp.eq.s32.totalorder %s930_s16, 0  ;;  %s37_s3 = sadd.s32 1, %s910_s11 }
  0x20   : > { %s1149_s28 = smov (%p26_p6, %s25_s28), 0  ;;  %s1151_s29 = smov (!%p26_p6, %s28_s29), %s926_s15 }
  0x21   : > { %1135 = sst [smem:[#allocation9_spill]] %s1149_s28  ;;  %s33_s30 = ssub.s32 %s922_s14, %s1149_s28 }
  0x22   : > { %726 = dma.hbm_to_vmem [thread:$0]  (!%p724_p7), %s1134_s1, 128, %s123_s22, [#allocation5], %s933_s24, %s933_s24, %s934_s25  }
  0x23   : > { %p30_p10 = scmp.ge.s32.totalorder %s1151_s29, 2  ;;  %p1029_p11 = por %p97_p3, %p44_p8 }
  0x24   : > { %p1033_p7 = por %p45_p9, %p44_p8  ;;  %s136_s6 = sand.u32 1, %s910_s11  }
  0x25   : > { %s1136_s4 = scalar_select %p1029_p11, 1, 0 }
  0x26   : > { %s1153_s29 = smov (%p30_p10, %s1151_s29), 0  ;;  %p732_p12 = scmp.lt.s32.totalorder %s930_s16, 8 }
  0x27   : > { %s647_s7 = sshll.u32 %s136_s6, 3  ;;  %s32_s8 = ssub.s32 %s926_s15, %s1153_s29 }
  0x28   : > { %s34_s9 = sor.u32 %s33_s30, %s32_s8  ;;  %s648_s17 = sshll.u32 %s926_s15, 2 }
  0x29   : > { %p35_p13 = scmp.eq.s32.totalorder %s34_s9, 0  ;;  %s145_s21 = sadd.s32 %s922_s14, %s648_s17 }
  0x2a   : > { %s649_s22 = sshll.u32 %s145_s21, 7  ;;  %s140_s23 = scalar_lea.vmem [#allocation2], %s647_s7 }
  0x2b   : > { %s149_s24 = sshll.u32 %s140_s23, 4  ;;  %s147_s1 = scalar_lea.hbm %s1126_s0, %s649_s22  ;;  %s150_s24 = int_to_ptr.vmem [resolvable:$true] %s149_s24 }
  0x2c   : > { %s1046_s25 = scalar_select %p35_p13, %s910_s11, %s37_s3  }
  0x2d   : > { %p1055_p0 = pnand %p732_p12, %p1033_p7  ;;  %s137_s30 = scalar_lea.sflag [#allocation3], %s136_s6 }
  0x2e   : > { %s845_s8 = scalar_lea.vmem %s150_s24, 128  ;;  %s935_s3 = smov [#allocation2]  }
  0x2f   : > { %p834_p2 = pneg %p1055_p0  ;;  %p846_p3 = scmp.ne.s32.totalorder %s150_s24, %s845_s8 }
  0x30   : > { %s850_s7 = sshll.u32 %s935_s3, 4  ;;  %s851_s7 = int_to_ptr.vmem [resolvable:$false] %s850_s7 }
  0x31   : > { %p848_p6 = pnand %p846_p3, %p834_p2  ;;  %s852_s9 = scalar_lea.vmem %s851_s7, 256 }
  0x32   : > { %p853_p9 = scmp.lt.s32.totalorder %s150_s24, %s851_s7  ;;  %p854_p10 = scmp.lt.s32.totalorder %s852_s9, %s845_s8 }
  0x33   : > { %p849_p8 = pneg %p848_p6 }
  0x34   : > { %p855_p13 = por %p854_p10, %p853_p9 }
  0x36   : > { %p856_p11 = pnand %p855_p13, %p849_p8 }
  0x38   : > { %859 = shalt.err (!%p856_p11)
}
  0x39   : > { %730 = dma.hbm_to_vmem [thread:$0]  (!%p1055_p0), %s147_s1, 128, %s150_s24, %s137_s30  }
  0x3a   : > { %158 = sbr.rel (%p1007_p5) target bundleno = 517 (0x205), region = 28  ;;  %s1066_s5 = sand.u32 (!%p1007_p5), 1, %s906_s10  }
  0x3b   : > { %s651_s6 = sshll.u32 (!%p1007_p5), %s1066_s5, 3  ;;  %s161_s17 = scalar_lea.sflag (!%p1007_p5), [#allocation3], %s1066_s5 }
  0x3c   : > { %s164_s21 = scalar_lea.vmem (!%p1007_p5), [#allocation2], %s651_s6 }
  0x3f   : > { %893 = dma.done.wait (%p1003_p4), %s161_s17, 128  }
  0x40   : > { %895 = vsyncadd (%p1003_p4), %s161_s17, 4294967168 }
  0x41   : > { %897 = dma.done.wait (%p995_p1), [#allocation5], 128  }
  0x42   : > { %899 = vsyncadd (%p995_p1), [#allocation5], 4294967168  ;;  %v936_v0 = vmov 0.0   ;;  %vm937_vm0 = vmmov 0   ;;  %v344_v1 = vld [vmem:[%s164_s21] sm:$0xff]  ;;  %v805_v3 = vld [vmem:[#allocation4] sm:$0xff]  }
  0x43   : > { %681 = vmatprep.subr.bf16.mxu0 %v936_v0  ;;  %687 = vmatprep.subr.bf16.mxu1 %v936_v0  ;;  %v345_v2 = vpack.c.bf16 %v344_v1, %v344_v1  ;;  %vm205_vm1 = vcmask 130048   ;;  %s938_s1 = smov 112   ;;  %s653_s18 = sshll.u32 %s1066_s5, 5  ;;  %vm336_vm2 = vcmask 64512  }
  0x44   : > { %683 = vmatprep.mubr.msk.bf16.mxu0 %vm937_vm0, %v936_v0  ;;  %689 = vmatprep.mubr.msk.bf16.mxu1 %vm937_vm0, %v936_v0  ;;  %s939_s19 = smov 120   ;;  %s187_s20 = scalar_lea.vmem [#allocation6], %s653_s18 }
  0x45   : > { %v346_v4 = vunpack.c.l.bf16 %v345_v2  ;;  %682 = vmatpush3.bf16.msra.mxu0 %v805_v3  ;;  %688 = vmatpush3.bf16.msra.mxu1 %v805_v3  ;;  %p1139_p1 = scmp.ne.s32.totalorder %s1136_s4, 0 }
  0x46   : > { %693 = vmatprep.subr.bf16.mxu0 %v936_v0  ;;  %699 = vmatprep.subr.bf16.mxu1 %v936_v0  ;;  %s665_s28 = sshll.u32 (%p1139_p1), %s918_s13, 4 }
  0x47   : > { %v347_v5 = vsub.f32 %v344_v1, %v346_v4  ;;  %s507_s22 = sadd.s32 (%p1139_p1), %s914_s12, %s665_s28 }
  0x48   : > { %690 = vmatmul.mubr.msk.bf16.vlgmr.msra.gmra.mxu1 %vm205_vm1, %v345_v2  ;;  %s666_s23 = sshll.u32 (%p1139_p1), %s507_s22, 3 }
  0x49   : > { %v348_v6 = vpack.c.bf16 %v347_v5, %v347_v5  ;;  %700 = vmatpush3.bf16.msra.mxu1 %v805_v3  ;;  %701 = vmatprep.mubr.msk.bf16.mxu1 %vm937_vm0, %v936_v0  ;;  %s509_s27 = scalar_lea.vmem (%p1139_p1), %s1128_s2, %s666_s23 }
  0x4a   : > { %711 = vmatprep.subr.bf16.mxu1 %v936_v0 }
  0x4b   : > { %353 = vrot.lane.b32.xlu0 %v348_v6, %s938_s1  ;;  %v349_v7 = vunpack.c.l.bf16 %v348_v6  ;;  %684 = vmatmul.mubr.msk.bf16.vlgmr.msra.gmra.mxu0 %vm205_vm1, %v348_v6 }
  0x4c   : > { %694 = vmatpush3.bf16.msra.mxu0 %v805_v3  ;;  %695 = vmatprep.mubr.msk.bf16.mxu0 %vm937_vm0, %v936_v0 }
  0x4d   : > { %v350_v8 = vsub.f32 %v347_v5, %v349_v7  ;;  %705 = vmatprep.subr.bf16.mxu0 %v936_v0 }
  0x4f   : > { %399 = vrot.lane.b32.xlu0 %v345_v2, %s938_s1  ;;  %v351_v9 = vpack.c.bf16 %v350_v8, %v350_v8 }
  0x51   : > { %445 = vrot.lane.b32.xlu1 %v351_v9, %s938_s1 }
  0x53   : > { %696 = vmatmul.mubr.msk.bf16.vlgmr.msra.gmra.mxu0 %vm205_vm1, %v351_v9 }
  0x54   : > { %706 = vmatpush3.bf16.msra.mxu0 %v805_v3  ;;  %707 = vmatprep.mubr.msk.bf16.mxu0 %vm937_vm0, %v936_v0 }
  0xbd   : > { %v354_v10 = vpop.permute.xlu0 %353 }
  0xbe   : > { %702 = vmatmul.mubr.msk.bf16.vlgmr.msra.gmra.mxu1 %vm205_vm1, %v354_v10 }
  0xbf   : > { %712 = vmatpush3.bf16.msra.mxu1 %v805_v3  ;;  %713 = vmatprep.mubr.msk.bf16.mxu1 %vm937_vm0, %v936_v0 }
  0xc1   : > { %v400_v11 = vpop.permute.xlu0 %399 }
  0xc2   : > { %708 = vmatmul.mubr.msk.bf16.vlgmr.msra.gmra.mxu0 %vm205_vm1, %v400_v11 }
  0xc3   : > { %v446_v12 = vpop.permute.xlu1 %445 }
  0xc6   : > { %714 = vmatmul.mubr.msk.bf16.vlgmr.msra.gmra.mxu1 %vm205_vm1, %v446_v12 }
 0x108   : > { %v286_v13 = vpop.f32.mrf.mxu1 }
 0x10a   : > { %v691_v14 = vpop.f32.mrf.mxu1 }
 0x10b   : > { %v243_v15 = vpop.f32.mrf.mxu0 }
 0x10c   : > { %v289_v16 = vpop.f32.mrf.mxu1  ;;  %v287_v20 = vadd.f32 %v286_v13, %v243_v15 }
 0x10d   : > { %v685_v17 = vpop.f32.mrf.mxu0 }
 0x10e   : > { %v692_v18 = vpop.f32.mrf.mxu1 }
 0x10f   : > { %v246_v19 = vpop.f32.mrf.mxu0 }
 0x111   : > { %v686_v21 = vpop.f32.mrf.mxu0 }
 0x113   : > { %v329_v22 = vpop.f32.mrf.mxu0 }
 0x114   : > { %v335_v23 = vadd.f32 %v329_v22, %v287_v20 }
 0x115   : > { %v697_v24 = vpop.f32.mrf.mxu0 }
 0x116   : > { %339 = vrot.lane.b32.xlu1 %v335_v23, %s939_s19  ;;  %337 = vst.msk [vmem:[%s187_s20] sm:$0xff] %vm336_vm2, %v335_v23 }
 0x117   : > { %v332_v25 = vpop.f32.mrf.mxu0 }
 0x119   : > { %v698_v26 = vpop.f32.mrf.mxu0 }
 0x11d   : > { %v544_v43 = vld [vmem:[%s187_s20] sm:$0xff] (%p1139_p1) }
 0x11e   : > { %545 = vst [vmem:[%s509_s27] sm:$0xff] (%p1139_p1), %v544_v43 }
 0x17e   : > { %v392_v27 = vpop.f32.mrf.mxu1 }
 0x180   : > { %v703_v28 = vpop.f32.mrf.mxu1 }
 0x182   : > { %v395_v29 = vpop.f32.mrf.mxu1  ;;  %v438_v30 = vpop.f32.mrf.mxu0 }
 0x183   : > { %v439_v33 = vadd.f32 %v438_v30, %v392_v27 }
 0x184   : > { %v704_v31 = vpop.f32.mrf.mxu1  ;;  %v709_v32 = vpop.f32.mrf.mxu0 }
 0x186   : > { %v441_v34 = vpop.f32.mrf.mxu0  ;;  %v484_v35 = vpop.f32.mrf.mxu1 }
 0x187   : > { %v490_v36 = vadd.f32 %v484_v35, %v439_v33 }
 0x188   : > { %v710_v37 = vpop.f32.mrf.mxu0  ;;  %v715_v38 = vpop.f32.mrf.mxu1 }
 0x189   : > { %494 = vrot.lane.b32.xlu0 %v490_v36, %s939_s19  ;;  %v340_v39 = vpop.permute.xlu1 %339  ;;  %662 = vst.msk [vmem:[%s187_s20 + $0x8] sm:$0xff] %vm336_vm2, %v490_v36 }
 0x18a   : > { %v487_v40 = vpop.f32.mrf.mxu1  ;;  %658 = vst.msk [vmem:[%s187_s20 + $0x10] sm:$0xff] %vm336_vm2, %v340_v39 }
 0x18c   : > { %v716_v41 = vpop.f32.mrf.mxu1 }
 0x190   : > { %v546_v44 = vld [vmem:[%s187_s20 + $0x8] sm:$0xff] (%p1139_p1) }
 0x191   : > { %v548_v45 = vld [vmem:[%s187_s20 + $0x10] sm:$0xff] (%p1139_p1)  ;;  %547 = vst [vmem:[%s509_s27 + $0x20] sm:$0xff] (%p1139_p1), %v546_v44 }
 0x192   : > { %549 = vst [vmem:[%s509_s27 + $0x40] sm:$0xff] (%p1139_p1), %v548_v45 }
 0x1f8   : > { %505 = sbr.rel (!%p1139_p1) target bundleno = 517 (0x205), region = 40 }
 0x1fb   : > { %v495_v42 = vpop.permute.xlu0 %494 }
 0x1fc   : > { %663 = vst.msk [vmem:[%s187_s20 + $0x18] sm:$0xff] %vm336_vm2, %v495_v42 }
 0x203   : > { %v550_v46 = vld [vmem:[%s187_s20 + $0x18] sm:$0xff] }
 0x204   : > { %551 = vst [vmem:[%s509_s27 + $0x60] sm:$0xff] %v550_v46 }
 0x205 PF: > { %s16_s16 = sadd.s32 1, %s930_s16   ;;  %s1140_s4 = sld [smem:[#allocation9_spill]] }
 0x206   : > { %p13_p4 = scmp.ge.s32.totalorder %s16_s16, 10   ;;  %s1141_s9 = smov %s906_s10 }
 0x207   : > { %s1142_s10 = smov %s910_s11  ;;  %s1143_s11 = smov %s1046_s25 }
 0x208   : > { %s1144_s12 = smov %s922_s14  ;;  %s1145_s13 = smov %s926_s15 }
 0x209   : > { %s1147_s15 = smov %s1153_s29  ;;  %15 = sbr.rel (!%p13_p4) target bundleno = 8 (0x8), region = 113 }
 0x20b   : > { %s1146_s14 = smov %s1140_s4 }
 0x20e   :  { %567 = vsyncpa [#allocation3], 1 }
 0x20f   :  { %569 = vsyncpa [#allocation3 + $0x1], 1 }
 0x210   :  { %570 = vsyncpa [#allocation5], 1 }

</bundles_post_ra>
